<compile_context>
chip_gen: v7x
topology: tpu7x:2x2x1
jax: 0.10.0
libtpu: 0.0.40
codegen_flags: <defaults>
</compile_context>

<pallas_src>
import functools

import jax
import jax.numpy as jnp
from jax.experimental import pallas as pl
from jax.experimental.pallas import tpu as pltpu


# ----------------------------------------------------------------------------- fused kernel
def _mst_block_kernel(x_ref, mg_ref, sc1_ref, sh1_ref, wt_ref, sc2_ref, sh2_ref,
                      o_ref, *, kt, pad, gcn_residual, tcn_residual):
    # x_ref:   (T, V*Cin)          one batch element, channels-last, joints*channels on lanes
    # mg_ref:  (V*Cin, V*Cout)     fused (A*edge) x 1x1-conv spatial operator (bf16)
    # sc1/sh1: (1, V*Cout)         folded BN1 scale / (BN1 shift + aggregated conv bias)
    # wt_ref:  (kt, V*Cout, V*Cout) block-diagonal temporal taps kron(I_V, Wt[dt]) (bf16)
    # sc2/sh2: (1, V*Cout)         folded BN2 scale / (BN2 shift + conv bias)
    # o_ref:   (T, V*Cout)         lane-dense output slab
    T = x_ref.shape[0]
    VCout = o_ref.shape[-1]

    x = x_ref[...]  # f32

    # ---- spatial GCN: single MXU matmul (contraction V*Cin, output V*Cout lanes) ----------
    z = jnp.dot(x.astype(jnp.bfloat16), mg_ref[...],
                preferred_element_type=jnp.float32)
    z = z * sc1_ref[...] + sh1_ref[...]
    if gcn_residual:           # identity residual, lane layouts match (Cin == Cout)
        z = z + x
    g = jnp.maximum(z, 0.0)

    # ---- temporal conv: kt lane-dense matmuls; shifts done via XLU roll + mask ------------
    g16 = g.astype(jnp.bfloat16)
    rows = jax.lax.broadcasted_iota(jnp.int32, (T, VCout), 0)
    acc = jnp.zeros((T, VCout), jnp.float32)
    for dt in range(kt):
        s = dt - pad           # h[t] += (g @ Wt_blk[dt])[t + s], zero-padded outside [0, T)
        p = jnp.dot(g16, wt_ref[dt], preferred_element_type=jnp.float32)
        if s != 0:
            p = pltpu.roll(p, (-s) % T, 0)
            p = jnp.where((rows >= -s) & (rows <= T - 1 - s), p, 0.0)
        acc = acc + p
    h = acc * sc2_ref[...] + sh2_ref[...]
    if tcn_residual:           # stride == 1 -> identity residual
        h = h + g
    o_ref[...] = jnp.maximum(h, 0.0).astype(o_ref.dtype)


# ----------------------------------------------------------------------------- weight folding
def _prepare_weights(p, eps=1e-5):
    K, Cin, Cout = p["gcn_w"].shape
    V = p["ae"].shape[1]

    # fused spatial operator: M[(v,ci),(w,c)] = sum_k (A*edge)[k,v,w] * W[k,ci,c]
    mg = jnp.einsum("kvw,kcd->vcwd", p["ae"], p["gcn_w"]).reshape(V * Cin, V * Cout)
    # conv bias propagated through the graph aggregation: bias[(w,c)] = sum_{k,v} A[k,v,w]*b[k,c]
    bias1 = jnp.einsum("kvw,kc->wc", p["ae"], p["gcn_b"][:, 0, :]).reshape(V * Cout)

    scale1 = p["bn1_gamma"] / jnp.sqrt(p["bn1_var"] + eps)
    shift1 = p["bn1_beta"] - p["bn1_mean"] * scale1
    sc1 = jnp.tile(scale1, V).reshape(1, V * Cout)
    sh1 = (jnp.tile(shift1, V) + bias1 * jnp.tile(scale1, V)).reshape(1, V * Cout)

    # temporal taps as block-diagonal (per-joint) matrices so the TCN matmul is 128-lane wide
    kt = p["tcn_w"].shape[0]
    eye_v = jnp.eye(V, dtype=jnp.float32)
    wtb = jnp.stack([jnp.kron(eye_v, p["tcn_w"][d]) for d in range(kt)])  # (kt, V*C, V*C)

    scale2 = p["bn2_gamma"] / jnp.sqrt(p["bn2_var"] + eps)
    shift2 = p["bn2_beta"] - p["bn2_mean"] * scale2 + p["tcn_b"] * scale2
    sc2 = jnp.tile(scale2, V).reshape(1, V * Cout)
    sh2 = jnp.tile(shift2, V).reshape(1, V * Cout)

    return (mg.astype(jnp.bfloat16), sc1, sh1, wtb.astype(jnp.bfloat16), sc2, sh2)


# ----------------------------------------------------------------------------- full block
def mst_gcn_block_forward(x_nchw, p, *, residual, kernel_size):
    N, Cin, T, V = x_nchw.shape
    Cout = p["gcn_w"].shape[2]
    pad = (kernel_size - 1) // 2

    mg, sc1, sh1, wtb, sc2, sh2 = _prepare_weights(p)
    # layout glue only: NCHW -> (N, T, V*Cin) with (joint, channel) flattened onto lanes
    x = jnp.transpose(x_nchw, (0, 2, 3, 1)).reshape(N, T, V * Cin).astype(jnp.float32)

    kernel = functools.partial(
        _mst_block_kernel, kt=kernel_size, pad=pad,
        gcn_residual=residual and (Cin == Cout), tcn_residual=residual)

    out = pl.pallas_call(
        kernel,
        out_shape=jax.ShapeDtypeStruct((N, T, V * Cout), jnp.float32),
        grid=(N,),
        in_specs=[
            pl.BlockSpec((None, T, V * Cin), lambda n: (n, 0, 0)),
            pl.BlockSpec((V * Cin, V * Cout), lambda n: (0, 0)),
            pl.BlockSpec((1, V * Cout), lambda n: (0, 0)),
            pl.BlockSpec((1, V * Cout), lambda n: (0, 0)),
            pl.BlockSpec((kernel_size, V * Cout, V * Cout), lambda n: (0, 0, 0)),
            pl.BlockSpec((1, V * Cout), lambda n: (0, 0)),
            pl.BlockSpec((1, V * Cout), lambda n: (0, 0)),
        ],
        out_specs=pl.BlockSpec((None, T, V * Cout), lambda n: (n, 0, 0)),
        compiler_params=pltpu.CompilerParams(dimension_semantics=("parallel",)),
    )(x, mg, sc1, sh1, wtb, sc2, sh2)

    return jnp.transpose(out.reshape(N, T, V, Cout), (0, 3, 1, 2))  # back to NCHW


# ----------------------------------------------------------------------------- parameters
def init_params(key, in_channels, out_channels, K, V, kernel_size):
    ks = jax.random.split(key, 12)
    p = {}
    p["gcn_w"] = 0.1 * jax.random.normal(ks[0], (K, in_channels, out_channels), jnp.float32)
    p["gcn_b"] = 0.1 * jax.random.normal(ks[1], (K, 1, out_channels), jnp.float32)
    A = jax.random.uniform(ks[2], (K, V, V), jnp.float32) / V   # synthetic adjacency stack
    edge = jnp.ones((K, V, V), jnp.float32)                      # edge importance init
    p["ae"] = A * edge
    p["bn1_gamma"] = 1.0 + 0.1 * jax.random.normal(ks[3], (out_channels,), jnp.float32)
    p["bn1_beta"] = 0.1 * jax.random.normal(ks[4], (out_channels,), jnp.float32)
    p["bn1_mean"] = 0.1 * jax.random.normal(ks[5], (out_channels,), jnp.float32)
    p["bn1_var"] = 1.0 + 0.1 * jnp.abs(jax.random.normal(ks[6], (out_channels,), jnp.float32))
    p["tcn_w"] = 0.1 * jax.random.normal(ks[7], (kernel_size, out_channels, out_channels), jnp.float32)
    p["tcn_b"] = 0.1 * jax.random.normal(ks[8], (out_channels,), jnp.float32)
    p["bn2_gamma"] = 1.0 + 0.1 * jax.random.normal(ks[9], (out_channels,), jnp.float32)
    p["bn2_beta"] = 0.1 * jax.random.normal(ks[10], (out_channels,), jnp.float32)
    p["bn2_mean"] = 0.1 * jax.random.normal(ks[11], (out_channels,), jnp.float32)
    p["bn2_var"] = 1.0 + 0.05 * jnp.arange(out_channels, dtype=jnp.float32)
    return p


# ----------------------------------------------------------------------------- pure-JAX reference
def ref_forward(x_nchw, p, *, residual, kernel_size):
    eps = 1e-5
    x = jnp.transpose(x_nchw, (0, 2, 3, 1)).astype(jnp.float32)  # (N, T, V, C)
    N, T, V, Cin = x.shape
    Cout = p["gcn_w"].shape[2]
    y = jnp.einsum("ntvc,kcd->nktvd", x, p["gcn_w"]) + p["gcn_b"][None, :, None, :, :]
    z = jnp.einsum("nktvd,kvw->ntwd", y, p["ae"])
    scale1 = p["bn1_gamma"] / jnp.sqrt(p["bn1_var"] + eps)
    shift1 = p["bn1_beta"] - p["bn1_mean"] * scale1
    z = z * scale1 + shift1
    if residual and Cin == Cout:
        z = z + x
    g = jnp.maximum(z, 0.0)

    pad = (kernel_size - 1) // 2
    gp = jnp.pad(g, ((0, 0), (pad, pad), (0, 0), (0, 0)))
    acc = jnp.zeros_like(g)
    for dt in range(kernel_size):
        acc = acc + jnp.einsum("ntvc,cd->ntvd", gp[:, dt:dt + T], p["tcn_w"][dt])
    scale2 = p["bn2_gamma"] / jnp.sqrt(p["bn2_var"] + eps)
    shift2 = p["bn2_beta"] - p["bn2_mean"] * scale2
    h = acc * scale2 + p["tcn_b"] * scale2 + shift2
    if residual:
        h = h + g
    h = jnp.maximum(h, 0.0)
    return jnp.transpose(h, (0, 3, 1, 2))


# ----------------------------------------------------------------------------- main
if __name__ == "__main__":
    N, Cin, T, V = 2, 8, 16, 16      # x in NCHW = (batch, channels, frames, joints)
    Cout, K, kernel_size = 8, 3, 3   # K adjacency subsets, temporal window 3, stride 1
    residual = True

    key = jax.random.PRNGKey(0)
    kx, kp = jax.random.split(key)
    x = jax.random.normal(kx, (N, Cin, T, V), jnp.float32)
    params = init_params(kp, Cin, Cout, K, V, kernel_size)

    out = mst_gcn_block_forward(x, params, residual=residual, kernel_size=kernel_size)
    out = jax.block_until_ready(out)

    ref = ref_forward(x, params, residual=residual, kernel_size=kernel_size)
    assert out.shape == (N, Cout, T, V), out.shape
    # bf16 MXU operands (f32 accumulation) -> compare to the f32 reference at bf16 tolerance
    if not bool(jnp.allclose(out, ref, rtol=1e-2, atol=1e-2)):
        raise AssertionError("Pallas kernel output mismatches JAX reference")

    print("KERNEL_OK")
</pallas_src>

<mosaic_0001>
module attributes {stable_mosaic.version = 11 : i64} {
  func.func @_mst_block_kernel(%arg0: i32, %arg1: memref<1x16x128xf32, #tpu.memory_space<vmem>>, %arg2: memref<128x128xbf16, #tpu.memory_space<vmem>>, %arg3: memref<1x128xf32, #tpu.memory_space<vmem>>, %arg4: memref<1x128xf32, #tpu.memory_space<vmem>>, %arg5: memref<3x128x128xbf16, #tpu.memory_space<vmem>>, %arg6: memref<1x128xf32, #tpu.memory_space<vmem>>, %arg7: memref<1x128xf32, #tpu.memory_space<vmem>>, %arg8: memref<1x16x128xf32, #tpu.memory_space<vmem>>) attributes {dimension_semantics = [#tpu.dimension_semantics<parallel>], iteration_bounds = array<i64: 2>, scalar_prefetch = 0 : i64, scratch_operands = 0 : i64, tpu.core_type = #tpu.core_type<tc>, window_params = [{transform_indices = @transform_0, window_bounds = array<i64: 1, 16, 128>}, {pipeline_mode = #tpu.pipeline_mode<synchronous>, transform_indices = @transform_1, window_bounds = array<i64: 128, 128>}, {pipeline_mode = #tpu.pipeline_mode<synchronous>, transform_indices = @transform_2, window_bounds = array<i64: 1, 128>}, {pipeline_mode = #tpu.pipeline_mode<synchronous>, transform_indices = @transform_3, window_bounds = array<i64: 1, 128>}, {pipeline_mode = #tpu.pipeline_mode<synchronous>, transform_indices = @transform_4, window_bounds = array<i64: 3, 128, 128>}, {pipeline_mode = #tpu.pipeline_mode<synchronous>, transform_indices = @transform_5, window_bounds = array<i64: 1, 128>}, {pipeline_mode = #tpu.pipeline_mode<synchronous>, transform_indices = @transform_6, window_bounds = array<i64: 1, 128>}, {transform_indices = @transform_7, window_bounds = array<i64: 1, 16, 128>}]} {
    %c0 = arith.constant 0 : index
    %c0_0 = arith.constant 0 : index
    %c0_1 = arith.constant 0 : index
    %0 = vector.load %arg1[%c0, %c0_0, %c0_1] : memref<1x16x128xf32, #tpu.memory_space<vmem>>, vector<1x16x128xf32>
    %1 = vector.shape_cast %0 : vector<1x16x128xf32> to vector<16x128xf32>
    %2 = arith.truncf %1 : vector<16x128xf32> to vector<16x128xbf16>
    %c0_2 = arith.constant 0 : index
    %c0_3 = arith.constant 0 : index
    %3 = vector.load %arg2[%c0_2, %c0_3] : memref<128x128xbf16, #tpu.memory_space<vmem>>, vector<128x128xbf16>
    %cst = arith.constant dense<0.000000e+00> : vector<16x128xf32>
    %4 = tpu.matmul %2, %3, %cst {dimension_numbers = #tpu.dot_dimension_numbers<[1], [0], [0], [1], [0, 0, 1, 1], [], []>} : vector<16x128xbf16>, vector<128x128xbf16>, vector<16x128xf32> -> vector<16x128xf32>
    %c0_4 = arith.constant 0 : index
    %c0_5 = arith.constant 0 : index
    %5 = vector.load %arg3[%c0_4, %c0_5] : memref<1x128xf32, #tpu.memory_space<vmem>>, vector<1x128xf32>
    %6 = vector.broadcast %5 : vector<1x128xf32> to vector<16x128xf32>
    %7 = arith.mulf %4, %6 : vector<16x128xf32>
    %c0_6 = arith.constant 0 : index
    %c0_7 = arith.constant 0 : index
    %8 = vector.load %arg4[%c0_6, %c0_7] : memref<1x128xf32, #tpu.memory_space<vmem>>, vector<1x128xf32>
    %9 = vector.broadcast %8 : vector<1x128xf32> to vector<16x128xf32>
    %10 = arith.addf %7, %9 : vector<16x128xf32>
    %11 = arith.addf %10, %1 : vector<16x128xf32>
    %cst_8 = arith.constant 0.000000e+00 : f32
    %12 = vector.broadcast %cst_8 : f32 to vector<16x128xf32>
    %13 = arith.maximumf %11, %12 : vector<16x128xf32>
    %14 = arith.truncf %13 : vector<16x128xf32> to vector<16x128xbf16>
    %15 = tpu.iota {dimensions = array<i32: 0>} : vector<16x128xi32>
    %cst_9 = arith.constant 0.000000e+00 : f32
    %16 = vector.broadcast %cst_9 : f32 to vector<16x128xf32>
    %c0_10 = arith.constant 0 : index
    %c0_11 = arith.constant 0 : index
    %c0_12 = arith.constant 0 : index
    %17 = vector.load %arg5[%c0_10, %c0_11, %c0_12] : memref<3x128x128xbf16, #tpu.memory_space<vmem>>, vector<1x128x128xbf16>
    %18 = vector.shape_cast %17 : vector<1x128x128xbf16> to vector<128x128xbf16>
    %cst_13 = arith.constant dense<0.000000e+00> : vector<16x128xf32>
    %19 = tpu.matmul %14, %18, %cst_13 {dimension_numbers = #tpu.dot_dimension_numbers<[1], [0], [0], [1], [0, 0, 1, 1], [], []>} : vector<16x128xbf16>, vector<128x128xbf16>, vector<16x128xf32> -> vector<16x128xf32>
    %c1_i32 = arith.constant 1 : i32
    %20 = tpu.dynamic_rotate %19 by %c1_i32 dim 0 : vector<16x128xf32>, i32 -> vector<16x128xf32>
    %c1_i32_14 = arith.constant 1 : i32
    %21 = vector.broadcast %c1_i32_14 : i32 to vector<16x128xi32>
    %22 = arith.cmpi sge, %15, %21 : vector<16x128xi32>
    %c16_i32 = arith.constant 16 : i32
    %23 = vector.broadcast %c16_i32 : i32 to vector<16x128xi32>
    %24 = arith.cmpi sle, %15, %23 : vector<16x128xi32>
    %25 = arith.andi %22, %24 : vector<16x128xi1>
    %cst_15 = arith.constant 0.000000e+00 : f32
    %26 = vector.broadcast %cst_15 : f32 to vector<16x128xf32>
    %27 = arith.select %25, %20, %26 : vector<16x128xi1>, vector<16x128xf32>
    %28 = arith.addf %16, %27 : vector<16x128xf32>
    %c1 = arith.constant 1 : index
    %c0_16 = arith.constant 0 : index
    %c0_17 = arith.constant 0 : index
    %29 = vector.load %arg5[%c1, %c0_16, %c0_17] : memref<3x128x128xbf16, #tpu.memory_space<vmem>>, vector<1x128x128xbf16>
    %30 = vector.shape_cast %29 : vector<1x128x128xbf16> to vector<128x128xbf16>
    %cst_18 = arith.constant dense<0.000000e+00> : vector<16x128xf32>
    %31 = tpu.matmul %14, %30, %cst_18 {dimension_numbers = #tpu.dot_dimension_numbers<[1], [0], [0], [1], [0, 0, 1, 1], [], []>} : vector<16x128xbf16>, vector<128x128xbf16>, vector<16x128xf32> -> vector<16x128xf32>
    %32 = arith.addf %28, %31 : vector<16x128xf32>
    %c2 = arith.constant 2 : index
    %c0_19 = arith.constant 0 : index
    %c0_20 = arith.constant 0 : index
    %33 = vector.load %arg5[%c2, %c0_19, %c0_20] : memref<3x128x128xbf16, #tpu.memory_space<vmem>>, vector<1x128x128xbf16>
    %34 = vector.shape_cast %33 : vector<1x128x128xbf16> to vector<128x128xbf16>
    %cst_21 = arith.constant dense<0.000000e+00> : vector<16x128xf32>
    %35 = tpu.matmul %14, %34, %cst_21 {dimension_numbers = #tpu.dot_dimension_numbers<[1], [0], [0], [1], [0, 0, 1, 1], [], []>} : vector<16x128xbf16>, vector<128x128xbf16>, vector<16x128xf32> -> vector<16x128xf32>
    %c15_i32 = arith.constant 15 : i32
    %36 = tpu.dynamic_rotate %35 by %c15_i32 dim 0 : vector<16x128xf32>, i32 -> vector<16x128xf32>
    %c-1_i32 = arith.constant -1 : i32
    %37 = vector.broadcast %c-1_i32 : i32 to vector<16x128xi32>
    %38 = arith.cmpi sge, %15, %37 : vector<16x128xi32>
    %c14_i32 = arith.constant 14 : i32
    %39 = vector.broadcast %c14_i32 : i32 to vector<16x128xi32>
    %40 = arith.cmpi sle, %15, %39 : vector<16x128xi32>
    %41 = arith.andi %38, %40 : vector<16x128xi1>
    %cst_22 = arith.constant 0.000000e+00 : f32
    %42 = vector.broadcast %cst_22 : f32 to vector<16x128xf32>
    %43 = arith.select %41, %36, %42 : vector<16x128xi1>, vector<16x128xf32>
    %44 = arith.addf %32, %43 : vector<16x128xf32>
    %c0_23 = arith.constant 0 : index
    %c0_24 = arith.constant 0 : index
    %45 = vector.load %arg6[%c0_23, %c0_24] : memref<1x128xf32, #tpu.memory_space<vmem>>, vector<1x128xf32>
    %46 = vector.broadcast %45 : vector<1x128xf32> to vector<16x128xf32>
    %47 = arith.mulf %44, %46 : vector<16x128xf32>
    %c0_25 = arith.constant 0 : index
    %c0_26 = arith.constant 0 : index
    %48 = vector.load %arg7[%c0_25, %c0_26] : memref<1x128xf32, #tpu.memory_space<vmem>>, vector<1x128xf32>
    %49 = vector.broadcast %48 : vector<1x128xf32> to vector<16x128xf32>
    %50 = arith.addf %47, %49 : vector<16x128xf32>
    %51 = arith.addf %50, %13 : vector<16x128xf32>
    %cst_27 = arith.constant 0.000000e+00 : f32
    %52 = vector.broadcast %cst_27 : f32 to vector<16x128xf32>
    %53 = arith.maximumf %51, %52 : vector<16x128xf32>
    %c0_28 = arith.constant 0 : index
    %c0_29 = arith.constant 0 : index
    %c0_30 = arith.constant 0 : index
    %54 = vector.load %arg8[%c0_28, %c0_29, %c0_30] : memref<1x16x128xf32, #tpu.memory_space<vmem>>, vector<1x16x128xf32>
    %55 = vector.shape_cast %54 : vector<1x16x128xf32> to vector<16x128xf32>
    %56 = vector.shape_cast %53 : vector<16x128xf32> to vector<1x16x128xf32>
    tpu.vector_store %arg8[%c0_28, %c0_29, %c0_30], %56 {strides = array<i32>} : memref<1x16x128xf32, #tpu.memory_space<vmem>>, vector<1x16x128xf32>,
    return
  }
  func.func @transform_0(%arg0: i32) -> (i32, i32, i32) {
    %c0_i32 = arith.constant 0 : i32
    %c0_i32_0 = arith.constant 0 : i32
    %c0_i32_1 = arith.constant 0 : i32
    return %arg0, %c0_i32, %c0_i32_0 : i32, i32, i32
  }
  func.func @transform_1(%arg0: i32) -> (i32, i32) {
    %c0_i32 = arith.constant 0 : i32
    %c0_i32_0 = arith.constant 0 : i32
    %c0_i32_1 = arith.constant 0 : i32
    return %c0_i32, %c0_i32_0 : i32, i32
  }
  func.func @transform_2(%arg0: i32) -> (i32, i32) {
    %c0_i32 = arith.constant 0 : i32
    %c0_i32_0 = arith.constant 0 : i32
    %c0_i32_1 = arith.constant 0 : i32
    return %c0_i32, %c0_i32_0 : i32, i32
  }
  func.func @transform_3(%arg0: i32) -> (i32, i32) {
    %c0_i32 = arith.constant 0 : i32
    %c0_i32_0 = arith.constant 0 : i32
    %c0_i32_1 = arith.constant 0 : i32
    return %c0_i32, %c0_i32_0 : i32, i32
  }
  func.func @transform_4(%arg0: i32) -> (i32, i32, i32) {
    %c0_i32 = arith.constant 0 : i32
    %c0_i32_0 = arith.constant 0 : i32
    %c0_i32_1 = arith.constant 0 : i32
    %c0_i32_2 = arith.constant 0 : i32
    return %c0_i32, %c0_i32_0, %c0_i32_1 : i32, i32, i32
  }
  func.func @transform_5(%arg0: i32) -> (i32, i32) {
    %c0_i32 = arith.constant 0 : i32
    %c0_i32_0 = arith.constant 0 : i32
    %c0_i32_1 = arith.constant 0 : i32
    return %c0_i32, %c0_i32_0 : i32, i32
  }
  func.func @transform_6(%arg0: i32) -> (i32, i32) {
    %c0_i32 = arith.constant 0 : i32
    %c0_i32_0 = arith.constant 0 : i32
    %c0_i32_1 = arith.constant 0 : i32
    return %c0_i32, %c0_i32_0 : i32, i32
  }
  func.func @transform_7(%arg0: i32) -> (i32, i32, i32) {
    %c0_i32 = arith.constant 0 : i32
    %c0_i32_0 = arith.constant 0 : i32
    %c0_i32_1 = arith.constant 0 : i32
    return %arg0, %c0_i32, %c0_i32_0 : i32, i32, i32
  }
}

</mosaic_0001>

<bundles_post_ra>
// kernel: tpu_custom_call.1
= control target key start
LH: loop header
LB: loop body
LE: loop exit
PB: predicated region body
PF: predicated region fallthrough
CT: control target
= control target key end

     0   :  { %12 = vsyncpa [#allocation3], 0  ;;  %s1737_s0 = inlined_call_operand.hbm [shape: f32[2,16,128], index: 0, kind: input, shape index: {}]   ;;  %s1738_s1 = inlined_call_operand.hbm [shape: bf16[128,128], index: 1, kind: input, shape index: {}]   ;;  %s1739_s2 = inlined_call_operand.vmem [shape: f32[1,128], index: 2, kind: input, shape index: {}]   ;;  %s1740_s3 = inlined_call_operand.vmem [shape: f32[1,128], index: 3, kind: input, shape index: {}]   ;;  %s1741_s4 = inlined_call_operand.hbm [shape: bf16[3,128,128], index: 4, kind: input, shape index: {}]   ;;  %s1742_s5 = inlined_call_operand.vmem [shape: f32[1,128], index: 5, kind: input, shape index: {}]   ;;  %s1743_s6 = inlined_call_operand.vmem [shape: f32[1,128], index: 6, kind: input, shape index: {}]   ;;  %s1744_s7 = inlined_call_operand.hbm [shape: f32[2,16,128], index: 7, kind: output, shape index: {}]  }
   0x1   :  { %14 = vsyncpa [#allocation3 + $0x1], 0 }
   0x2   :  { %15 = vsyncpa [#allocation6], 0 }
   0x3   :  { %16 = vsyncpa [#allocation4], 0 }
   0x4   :  { %18 = vsyncpa [#allocation4 + $0x1], 0  ;;  %s1429_s24 = smov 0   ;;  %s1431_s25 = smov 0  }
   0x5   :  { %s1433_s26 = smov 0   ;;  %s1435_s27 = smov 0  }
   0x6 LB: > { %s1450_s28 = sadd.s32 4294967295, %s1375_s27   ;;  %s940_s29 = sadd.s32 4294967294, %s1375_s27   ;;  %s1375_s27 = sphi %s1435_s27, %s1764_s27   ;;  %s1371_s26 = sphi %s1433_s26, %s1763_s26   ;;  %s1367_s25 = sphi %s1431_s25, %s1762_s25   ;;  %s1363_s24 = sphi %s1429_s24, %s1761_s24  }
   0x7   : > { %p44_p0 = scmp.ne.s32.totalorder %s1367_s25, %s1363_s24  ;;  %p1745_p1 = scmp.eq.s32.totalorder %s1450_s28, 0 }
   0x8   : > { %p200_p3 = scmp.eq.s32.totalorder %s940_s29, 1  ;;  %p941_p5 = scmp.ge.s32.totalorder %s1375_s27, 1 }
   0x9   : > { %p1459_p4 = por %p1745_p1, %p44_p0  ;;  %p207_p7 = scmp.lt.s32.totalorder %s1375_s27, 3 }
   0xa   : > { %p1464_p6 = por %p200_p3, %p44_p0  ;;  %s1377_s10 = smov [#allocation5]  }
   0xb   : > { %s1748_s30 = scalar_select %p1459_p4, 1, 0 }
   0xc   : > { %s1749_s8 = scalar_select %p1464_p6, 1, 0 }
   0xd   : > { %p1469_p8 = pnand %p941_p5, %p207_p7  ;;  %s219_s11 = sshll.u32 %s1377_s10, 4  ;;  %s1473_s11 = int_to_ptr.vmem [resolvable:$true] %s219_s11 }
   0xe   : > { %s1378_s13 = smov [#allocation7]   ;;  %s1219_s17 = scalar_lea.hbm %s1738_s1, 1024 }
   0xf   : > { %p1124_p9 = pneg %p1469_p8  ;;  %s238_s14 = sshll.u32 %s1378_s13, 4  ;;  %s1484_s14 = int_to_ptr.vmem [resolvable:$true] %s238_s14 }
  0x10   : > { %p1220_p12 = scmp.ne.s32.totalorder %s1738_s1, %s1219_s17  ;;  %p1226_p5 = scmp.lt.u32.totalorder %s1219_s17, %s1738_s1 }
  0x11   : > { %p1480_p11 = pnand %p1124_p9, %p1745_p1 }
  0x13   : > { %p1221_p13 = pneg %p1480_p11 }
  0x15   : > { %p1222_p0 = pnand %p1221_p13, %p1220_p12 }
  0x17   : > { %p1223_p3 = pneg %p1222_p0 }
  0x19   : > { %p1228_p7 = pnand %p1226_p5, %p1223_p3 }
  0x1b   : > { %1231 = shalt.err (!%p1228_p7)
}
  0x1c   : > { %s1232_s22 = scalar_lea.vmem %s1473_s11, 1024  ;;  %p1240_p2 = scmp.lt.s32.totalorder %s1473_s11, %s1473_s11 }
  0x1d   : > { %p1233_p9 = scmp.ne.s32.totalorder %s1473_s11, %s1232_s22  ;;  %p1241_p12 = scmp.lt.s32.totalorder %s1232_s22, %s1232_s22 }
  0x1f   : > { %p1235_p10 = pnand %p1233_p9, %p1221_p13  ;;  %p1242_p0 = por %p1241_p12, %p1240_p2 }
  0x21   : > { %p1236_p1 = pneg %p1235_p10 }
  0x23   : > { %p1243_p6 = pnand %p1242_p0, %p1236_p1 }
  0x25   : > { %1246 = shalt.err (!%p1243_p6)
}
  0x26   : > { %s1379_s23 = smov 64   ;;  %s1380_s29 = smov 4  }
  0x27   : > { %1127 = dma.hbm_to_vmem [thread:$0]  (!%p1480_p11), %s1738_s1, 1024, %s1473_s11, [#allocation6], %s1379_s23, %s1379_s23, %s1380_s29  }
  0x28   : > { %s1247_s17 = scalar_lea.hbm %s1741_s4, 3072 }
  0x29   : > { %p1248_p2 = scmp.ne.s32.totalorder %s1741_s4, %s1247_s17  ;;  %p1254_p10 = scmp.lt.u32.totalorder %s1247_s17, %s1741_s4 }
  0x2b   : > { %p1250_p1 = pnand %p1248_p2, %p1221_p13 }
  0x2d   : > { %p1251_p6 = pneg %p1250_p1 }
  0x2f   : > { %p1256_p3 = pnand %p1254_p10, %p1251_p6 }
  0x31   : > { %1259 = shalt.err (!%p1256_p3)
}
  0x32   : > { %s1260_s11 = scalar_lea.vmem %s1484_s14, 3072  ;;  %p1268_p12 = scmp.lt.s32.totalorder %s1484_s14, %s1484_s14 }
  0x33   : > { %p1261_p5 = scmp.ne.s32.totalorder %s1484_s14, %s1260_s11  ;;  %p1269_p0 = scmp.lt.s32.totalorder %s1260_s11, %s1260_s11 }
  0x35   : > { %p1263_p7 = pnand %p1261_p5, %p1221_p13  ;;  %p1270_p2 = por %p1269_p0, %p1268_p12 }
  0x37   : > { %p1264_p9 = pneg %p1263_p7 }
  0x39   : > { %p1271_p1 = pnand %p1270_p2, %p1264_p9 }
  0x3b   : > { %1274 = shalt.err (!%p1271_p1)
}
  0x3c   : > { %1130 = dma.hbm_to_vmem [thread:$0]  (!%p1480_p11), %s1741_s4, 3072, %s1484_s14, [#allocation6], %s1379_s23, %s1379_s23, %s1380_s29  }
  0x3d   : > { %s1539_s13 = sadd.s32 1, %s1375_s27   ;;  %s31_s12 = sadd.s32 1, %s1371_s26 }
  0x3e   : > { %s28_s15 = ssub.s32 %s1375_s27, %s1539_s13  ;;  %p38_p13 = scmp.ne.s32.totalorder %s1371_s26, %s1367_s25 }
  0x3f   : > { %p29_p6 = scmp.eq.s32.totalorder %s28_s15, 0  ;;  %p39_p10 = scmp.eq.s32.totalorder %s1375_s27, 0 }
  0x40   : > { %p1752_p3 = scmp.eq.s32.totalorder %s1450_s28, 1  ;;  %p1141_p7 = scmp.lt.s32.totalorder %s1375_s27, 2 }
  0x41   : > { %s1555_s17 = scalar_select %p29_p6, %s1371_s26, %s31_s12  }
  0x42   : > { %p1549_p5 = por %p1752_p3, %p38_p13  ;;  %p40_p9 = por %p39_p10, %p38_p13 }
  0x43   : > { %s258_s18 = sand.u32 1, %s1371_s26   ;;  %s994_s14 = sshll.u32 %s1375_s27, 8 }
  0x44   : > { %s1753_s16 = scalar_select %p1549_p5, 1, 0 }
  0x45   : > { %s945_s19 = sshll.u32 %s258_s18, 4  ;;  %s1562_s20 = scalar_lea.hbm %s1737_s0, %s994_s14 }
  0x46   : > { %s262_s21 = scalar_lea.vmem [#allocation2], %s945_s19  ;;  %p1566_p11 = pnand %p1141_p7, %p40_p9 }
  0x47   : > { %s269_s11 = sshll.u32 %s262_s21, 4  ;;  %s1570_s10 = scalar_lea.sflag [#allocation3], %s258_s18  ;;  %s1564_s11 = int_to_ptr.vmem [resolvable:$true] %s269_s11 }
  0x48   : > { %s1275_s12 = scalar_lea.hbm %s1562_s20, 256  ;;  %p1277_p0 = pneg %p1566_p11 }
  0x49   : > { %p1276_p12 = scmp.ne.s32.totalorder %s1562_s20, %s1275_s12  ;;  %s1280_s14 = scalar_lea.hbm %s1737_s0, 512 }
  0x4a   : > { %p1281_p13 = scmp.lt.u32.totalorder %s1562_s20, %s1737_s0  ;;  %p1282_p6 = scmp.lt.u32.totalorder %s1280_s14, %s1275_s12 }
  0x4b   : > { %p1278_p2 = pnand %p1277_p0, %p1276_p12  ;;  %p1284_p3 = scmp.lt.u32.totalorder %s1275_s12, %s1562_s20 }
  0x4c   : > { %p1283_p10 = por %p1282_p6, %p1281_p13 }
  0x4d   : > { %p1279_p1 = pneg %p1278_p2 }
  0x4e   : > { %p1285_p7 = por %p1284_p3, %p1283_p10 }
  0x50   : > { %p1286_p9 = pnand %p1285_p7, %p1279_p1 }
  0x52   : > { %1289 = shalt.err (!%p1286_p9)
}
  0x53   : > { %s1290_s18 = scalar_lea.vmem %s1564_s11, 256  ;;  %s1381_s21 = smov [#allocation2]  }
  0x54   : > { %p1291_p12 = scmp.ne.s32.totalorder %s1564_s11, %s1290_s18  ;;  %s1295_s15 = sshll.u32 %s1381_s21, 4  ;;  %s1296_s15 = int_to_ptr.vmem [resolvable:$false] %s1295_s15 }
  0x55   : > { %s1297_s19 = scalar_lea.vmem %s1296_s15, 512  ;;  %p1298_p4 = scmp.lt.s32.totalorder %s1564_s11, %s1296_s15 }
  0x56   : > { %p1293_p2 = pnand %p1291_p12, %p1277_p0  ;;  %p1299_p13 = scmp.lt.s32.totalorder %s1297_s19, %s1290_s18 }
  0x58   : > { %p1294_p5 = pneg %p1293_p2  ;;  %p1300_p6 = por %p1299_p13, %p1298_p4 }
  0x5a   : > { %p1301_p10 = pnand %p1300_p6, %p1294_p5 }
  0x5c   : > { %1304 = shalt.err (!%p1301_p10)
}
  0x5d   : > { %s1382_s12 = smov 128   ;;  %s1383_s14 = smov 8  }
  0x5e   : > { %1134 = dma.hbm_to_vmem [thread:$0]  (!%p1566_p11), %s1562_s20, 256, %s1564_s11, %s1570_s10, %s1382_s12, %s1382_s12, %s1383_s14  }
  0x5f   : > { %281 = sbr.rel (%p1469_p8) target bundleno = 639 (0x27f), region = 48  ;;  %s1601_s23 = sand.u32 (!%p1469_p8), 1, %s1367_s25  }
  0x60   : > { %s949_s29 = sshll.u32 (!%p1469_p8), %s1601_s23, 4  ;;  %s284_s18 = scalar_lea.sflag (!%p1469_p8), [#allocation3], %s1601_s23 }
  0x61   : > { %s1607_s21 = scalar_lea.vmem (!%p1469_p8), [#allocation2], %s949_s29  ;;  %p1755_p4 = scmp.ne.s32.totalorder (!%p1469_p8), %s1748_s30, 0 }
  0x66   : > { %1350 = dma.done.wait (%p1755_p4), %s284_s18, 256  }
  0x67   : > { %1352 = vsyncadd (%p1755_p4), %s284_s18, 4294967040  ;;  %p1756_p5 = scmp.eq.s32.totalorder %s1450_s28, 0 }
  0x69   : > { %1354 = dma.done.wait (%p1756_p5), [#allocation6], 4096   ;;  %p1757_p8 = pmov %p1756_p5 }
  0x6a   : > { %v1384_v0 = vmov 0.0   ;;  %vm1385_vm0 = vmmov 0   ;;  %v1187_v1 = vld [vmem:[#allocation5] sm:$0xff]   ;;  %v1188_v2 = vld [vmem:[#allocation5 + $0x8] sm:$0xff]   ;;  %v1189_v3 = vld [vmem:[#allocation5 + $0x10] sm:$0xff]   ;;  %v458_v51 = vlaneseq  ;;  %s995_s12 = sshll.u32 %s1450_s28, 8 }
  0x6b   : > { %1356 = vsyncadd (%p1757_p8), [#allocation6], 4294963200  ;;  %1032 = vmatprep.subr.bf16.mxu0 %v1384_v0  ;;  %1048 = vmatprep.mubr.msk.bf16.mxu0 %vm1385_vm0, %v1384_v0  ;;  %v1195_v4 = vld [vmem:[#allocation7] sm:$0xff]   ;;  %v1190_v5 = vld [vmem:[#allocation5 + $0x18] sm:$0xff]   ;;  %s325_s14 = scalar_lea.vmem [#allocation8], %s949_s29  ;;  %s1691_s9 = scalar_lea.hbm %s1744_s7, %s995_s12 }
  0x6c   : > { %1052 = vmatprep.subr.bf16.mxu1 %v1384_v0  ;;  %1068 = vmatprep.mubr.msk.bf16.mxu1 %vm1385_vm0, %v1384_v0  ;;  %v1197_v6 = vld [vmem:[#allocation7 + $0x8] sm:$0xff]   ;;  %v1191_v7 = vld [vmem:[#allocation5 + $0x20] sm:$0xff]   ;;  %v1199_v8 = vld [vmem:[#allocation7 + $0x10] sm:$0xff]   ;;  %v459_v52 = vshrl.u32 %v458_v51, 7  ;;  %s848_s18 = sshll.u32 %s325_s14, 4  ;;  %s835_s28 = scalar_lea.sflag [#allocation4], %s1601_s23  ;;  %s1693_s18 = int_to_ptr.vmem [resolvable:$true] %s848_s18 }
  0x6d   : > { %1033 = vmatpush3.bf16.msra.mxu0 %v1187_v1  ;;  %1053 = vmatpush3.bf16.msra.mxu1 %v1195_v4  ;;  %v1192_v9 = vld [vmem:[#allocation5 + $0x28] sm:$0xff]   ;;  %v1201_v10 = vld [vmem:[#allocation7 + $0x18] sm:$0xff]   ;;  %v1193_v11 = vld [vmem:[#allocation5 + $0x30] sm:$0xff]   ;;  %s1305_s29 = scalar_lea.vmem %s1693_s18, 256  ;;  %p1758_p0 = scmp.ne.s32.totalorder %s1753_s16, 0 }
  0x6e   : > { %1034 = vmatprep.subr.bf16.mxu0 %v1384_v0  ;;  %1054 = vmatprep.subr.bf16.mxu1 %v1384_v0  ;;  %v1203_v12 = vld [vmem:[#allocation7 + $0x20] sm:$0xff]   ;;  %v1194_v13 = vld [vmem:[#allocation5 + $0x38] sm:$0xff]   ;;  %v1198_v18 = vld [vmem:[#allocation7 + $0x48] sm:$0xff]   ;;  %vm568_vm1 = vcmp.lt.s32.totalorder %v459_v52, 1  ;;  %vm571_vm2 = vcmp.ge.s32.totalorder %v459_v52, 1  ;;  %v460_v4 = vadd.s32 8, %v459_v52  ;;  %p1306_p11 = scmp.ne.s32.totalorder %s1693_s18, %s1305_s29 }
  0x6f   : > { %v327_v14 = vld [vmem:[%s1607_s21] sm:$0xff]  ;;  %v328_v15 = vld [vmem:[%s1607_s21 + $0x8] sm:$0xff]  ;;  %vm797_vm3 = vcmp.lt.s32.totalorder %v459_v52, 7  ;;  %s1386_s20 = smov [#allocation8]  }
  0x70   : > { %v329_v16 = vpack.c.bf16 %v328_v15, %v327_v14  ;;  %v1196_v17 = vld [vmem:[#allocation7 + $0x40] sm:$0xff]   ;;  %v1200_v19 = vld [vmem:[#allocation7 + $0x50] sm:$0xff]   ;;  %v1202_v20 = vld [vmem:[#allocation7 + $0x58] sm:$0xff]   ;;  %vm803_vm4 = vcmp.le.s32.totalorder %v460_v4, 14  ;;  %p1307_p1 = pnand %p1306_p11, %p1758_p0  ;;  %s1309_s11 = sshll.u32 %s1386_s20, 4  ;;  %s1310_s11 = int_to_ptr.vmem [resolvable:$false] %s1309_s11 }
  0x71   : > { %1035 = vmatpush3.bf16.msra.mxu0 %v1188_v2  ;;  %1055 = vmatpush3.bf16.msra.mxu1 %v1197_v6  ;;  %v1204_v21 = vld [vmem:[#allocation7 + $0x60] sm:$0xff]   ;;  %v1205_v22 = vld [vmem:[#allocation7 + $0x28] sm:$0xff]   ;;  %v1207_v24 = vld [vmem:[#allocation7 + $0x30] sm:$0xff]   ;;  %s1311_s22 = scalar_lea.vmem %s1310_s11, 512  ;;  %p1312_p7 = scmp.lt.s32.totalorder %s1693_s18, %s1310_s11 }
  0x72   : > { %1036 = vmatprep.subr.bf16.mxu0 %v1384_v0  ;;  %1056 = vmatprep.subr.bf16.mxu1 %v1384_v0  ;;  %v1206_v23 = vld [vmem:[#allocation7 + $0x68] sm:$0xff]   ;;  %v1208_v25 = vld [vmem:[#allocation7 + $0x70] sm:$0xff]   ;;  %v1209_v26 = vld [vmem:[#allocation7 + $0x38] sm:$0xff]   ;;  %p1308_p3 = pneg %p1307_p1  ;;  %p1313_p9 = scmp.lt.s32.totalorder %s1311_s22, %s1305_s29 }
  0x73   : > { %v1210_v27 = vld [vmem:[#allocation7 + $0x78] sm:$0xff]   ;;  %v961_v28 = vld [vmem:[%s1739_s2] ss:$0 sm:$0xff]  ;;  %v1212_v44 = vld [vmem:[#allocation7 + $0x88] sm:$0xff]  }
  0x74   : > { %v962_v30 = vld [vmem:[%s1740_s3] ss:$0 sm:$0xff]  ;;  %v1213_v45 = vld [vmem:[#allocation7 + $0x90] sm:$0xff]   ;;  %v1214_v46 = vld [vmem:[#allocation7 + $0x98] sm:$0xff]   ;;  %p1314_p12 = por %p1313_p9, %p1312_p7 }
  0x75   : > { %1037 = vmatpush3.bf16.msra.mxu0 %v1189_v3  ;;  %1057 = vmatpush3.bf16.msra.mxu1 %v1199_v8  ;;  %v1211_v42 = vld [vmem:[#allocation7 + $0x80] sm:$0xff]   ;;  %v1216_v48 = vld [vmem:[#allocation7 + $0xa8] sm:$0xff]   ;;  %v1217_v49 = vld [vmem:[#allocation7 + $0xb0] sm:$0xff]  }
  0x76   : > { %1038 = vmatprep.subr.bf16.mxu0 %v1384_v0  ;;  %1058 = vmatprep.subr.bf16.mxu1 %v1384_v0  ;;  %v1215_v47 = vld [vmem:[#allocation7 + $0xa0] sm:$0xff]   ;;  %v1218_v50 = vld [vmem:[#allocation7 + $0xb8] sm:$0xff]   ;;  %p1315_p2 = pnand %p1314_p12, %p1308_p3 }
  0x79   : > { %1039 = vmatpush3.bf16.msra.mxu0 %v1190_v5  ;;  %1059 = vmatpush3.bf16.msra.mxu1 %v1201_v10 }
  0x7a   : > { %1040 = vmatprep.subr.bf16.mxu0 %v1384_v0  ;;  %1060 = vmatprep.subr.bf16.mxu1 %v1384_v0 }
  0x7d   : > { %1041 = vmatpush3.bf16.msra.mxu0 %v1191_v7  ;;  %1061 = vmatpush3.bf16.msra.mxu1 %v1203_v12 }
  0x7e   : > { %1042 = vmatprep.subr.bf16.mxu0 %v1384_v0  ;;  %1062 = vmatprep.subr.bf16.mxu1 %v1384_v0 }
  0x81   : > { %1043 = vmatpush3.bf16.msra.mxu0 %v1192_v9  ;;  %1063 = vmatpush3.bf16.msra.mxu1 %v1205_v22 }
  0x82   : > { %1044 = vmatprep.subr.bf16.mxu0 %v1384_v0  ;;  %1064 = vmatprep.subr.bf16.mxu1 %v1384_v0 }
  0x85   : > { %1045 = vmatpush3.bf16.msra.mxu0 %v1193_v11  ;;  %1065 = vmatpush3.bf16.msra.mxu1 %v1207_v24 }
  0x86   : > { %1046 = vmatprep.subr.bf16.mxu0 %v1384_v0  ;;  %1066 = vmatprep.subr.bf16.mxu1 %v1384_v0 }
  0x89   : > { %1047 = vmatpush3.bf16.msra.mxu0 %v1194_v13  ;;  %1067 = vmatpush3.bf16.msra.mxu1 %v1209_v26  ;;  %v987_v13 = vld [vmem:[%s1742_s5] ss:$0 sm:$0xff] }
  0x8a   : > { %1072 = vmatprep.subr.bf16.mxu0 %v1384_v0  ;;  %1092 = vmatprep.subr.bf16.mxu1 %v1384_v0 }
  0x8c   : > { %1049 = vmatmul.mubr.bf16.vlgmr.msra.gmra.mrb[0].mxu0 %v329_v16 }
  0x8d   : > { %1073 = vmatpush3.bf16.msra.mxu0 %v1196_v17  ;;  %1088 = vmatprep.mubr.msk.bf16.mxu0 %vm1385_vm0, %v1384_v0  ;;  %v988_v17 = vld [vmem:[%s1743_s6] ss:$0 sm:$0xff] }
  0x8e   : > { %1074 = vmatprep.subr.bf16.mxu0 %v1384_v0 }
  0x91   : > { %1075 = vmatpush3.bf16.msra.mxu0 %v1198_v18 }
  0x92   : > { %1076 = vmatprep.subr.bf16.mxu0 %v1384_v0 }
  0x95   : > { %1077 = vmatpush3.bf16.msra.mxu0 %v1200_v19 }
  0x96   : > { %1078 = vmatprep.subr.bf16.mxu0 %v1384_v0 }
  0x99   : > { %1079 = vmatpush3.bf16.msra.mxu0 %v1202_v20 }
  0x9a   : > { %1080 = vmatprep.subr.bf16.mxu0 %v1384_v0 }
  0x9d   : > { %1081 = vmatpush3.bf16.msra.mxu0 %v1204_v21 }
  0x9e   : > { %1082 = vmatprep.subr.bf16.mxu0 %v1384_v0 }
  0xa1   : > { %1083 = vmatpush3.bf16.msra.mxu0 %v1206_v23 }
  0xa2   : > { %1084 = vmatprep.subr.bf16.mxu0 %v1384_v0 }
  0xa5   : > { %1085 = vmatpush3.bf16.msra.mxu0 %v1208_v25 }
  0xa6   : > { %1086 = vmatprep.subr.bf16.mxu0 %v1384_v0 }
  0xa9   : > { %1087 = vmatpush3.bf16.msra.mxu0 %v1210_v27 }
 0x15f   : > { %v428_v29 = vpop.f32.mrb[0].mxu0 }
 0x160   : > { %v442_v31 = vmul.f32 %v961_v28, %v428_v29  ;;  %v1050_v32 = vpop.f32.mrb[1].mxu0 }
 0x161   : > { %v431_v33 = vpop.f32.mrb[2].mxu0 }
 0x162   : > { %v451_v34 = vadd.f32 %v962_v30, %v442_v31  ;;  %v443_v35 = vmul.f32 %v961_v28, %v431_v33  ;;  %v1051_v36 = vpop.f32.mrb[3].mxu0 }
 0x164   : > { %v1656_v37 = vadd.f32 %v451_v34, %v327_v14  ;;  %v452_v38 = vadd.f32 %v962_v30, %v443_v35 }
 0x166   : > { %v1658_v39 = vadd.f32 %v452_v38, %v328_v15  ;;  %v455_v40 = vmax.f32 %v1656_v37, 0.0 }
 0x168   : > { %v456_v41 = vmax.f32 %v1658_v39, 0.0 }
 0x16a   : > { %v457_v43 = vpack.c.bf16 %v456_v41, %v455_v40 }
 0x16c   : > { %1069 = vmatmul.mubr.bf16.vlgmr.msra.gmra.mrb[0].mxu1 %v457_v43  ;;  %1089 = vmatmul.mubr.bf16.vlgmr.msra.gmra.mrb[4].mxu0 %v457_v43 }
 0x16d   : > { %1093 = vmatpush3.bf16.msra.mxu1 %v1211_v42  ;;  %1108 = vmatprep.mubr.msk.bf16.mxu1 %vm1385_vm0, %v1384_v0 }
 0x16e   : > { %1094 = vmatprep.subr.bf16.mxu1 %v1384_v0 }
 0x171   : > { %1095 = vmatpush3.bf16.msra.mxu1 %v1212_v44 }
 0x172   : > { %1096 = vmatprep.subr.bf16.mxu1 %v1384_v0 }
 0x175   : > { %1097 = vmatpush3.bf16.msra.mxu1 %v1213_v45 }
 0x176   : > { %1098 = vmatprep.subr.bf16.mxu1 %v1384_v0 }
 0x179   : > { %1099 = vmatpush3.bf16.msra.mxu1 %v1214_v46 }
 0x17a   : > { %1100 = vmatprep.subr.bf16.mxu1 %v1384_v0 }
 0x17d   : > { %1101 = vmatpush3.bf16.msra.mxu1 %v1215_v47 }
 0x17e   : > { %1102 = vmatprep.subr.bf16.mxu1 %v1384_v0 }
 0x181   : > { %1103 = vmatpush3.bf16.msra.mxu1 %v1216_v48 }
 0x182   : > { %1104 = vmatprep.subr.bf16.mxu1 %v1384_v0 }
 0x185   : > { %1105 = vmatpush3.bf16.msra.mxu1 %v1217_v49 }
 0x186   : > { %1106 = vmatprep.subr.bf16.mxu1 %v1384_v0 }
 0x189   : > { %1107 = vmatpush3.bf16.msra.mxu1 %v1218_v50 }
 0x18c   : > { %1109 = vmatmul.mubr.bf16.vlgmr.msra.gmra.mrb[4].mxu1 %v457_v43 }
 0x23f   : > { %v559_v53 = vpop.f32.mrb[0].mxu1  ;;  %v680_v54 = vpop.f32.mrb[4].mxu0 }
 0x240   : > { %v1070_v55 = vpop.f32.mrb[1].mxu1  ;;  %v1090_v56 = vpop.f32.mrb[5].mxu0  ;;  %v566_v59 = vrot.slane %v559_v53, 7 }
 0x241   : > { %v562_v57 = vpop.f32.mrb[2].mxu1  ;;  %v683_v58 = vpop.f32.mrb[6].mxu0 }
 0x242   : > { %v567_v60 = vrot.slane %v562_v57, 7  ;;  %v1071_v61 = vpop.f32.mrb[3].mxu1  ;;  %v1091_v62 = vpop.f32.mrb[7].mxu0 }
 0x244   : > { %v569_v63 = vsel %vm568_vm1, %v566_v59, %v567_v60  ;;  %v570_v1 = vsel %vm568_vm1, %v567_v60, %v566_v59 }
 0x245   : > { %v577_v2 = vsel %vm571_vm2, %v570_v1, 0.0  ;;  %v688_v0 = vadd.f32 %v683_v58, %v569_v63 }
 0x246   : > { %v687_v3 = vadd.f32 %v680_v54, %v577_v2 }
 0x25f   : > { %v788_v5 = vpop.f32.mrb[4].mxu1 }
 0x260   : > { %v1110_v6 = vpop.f32.mrb[5].mxu1  ;;  %v795_v8 = vrot.slane %v788_v5, 1 }
 0x261   : > { %v791_v7 = vpop.f32.mrb[6].mxu1 }
 0x262   : > { %v796_v9 = vrot.slane %v791_v7, 1  ;;  %v1111_v10 = vpop.f32.mrb[7].mxu1 }
 0x264   : > { %v798_v11 = vsel %vm797_vm3, %v795_v8, %v796_v9  ;;  %v799_v12 = vsel %vm797_vm3, %v796_v9, %v795_v8 }
 0x265   : > { %v807_v14 = vsel %vm803_vm4, %v799_v12, 0.0  ;;  %v808_v15 = vadd.f32 %v798_v11, %v687_v3 }
 0x266   : > { %v809_v16 = vadd.f32 %v807_v14, %v688_v0 }
 0x267   : > { %v817_v18 = vmul.f32 %v987_v13, %v808_v15 }
 0x268   : > { %v818_v19 = vmul.f32 %v987_v13, %v809_v16 }
 0x269   : > { %v826_v20 = vadd.f32 %v988_v17, %v817_v18 }
 0x26a   : > { %v827_v21 = vadd.f32 %v988_v17, %v818_v19 }
 0x26b   : > { %v828_v22 = vadd.f32 %v826_v20, %v455_v40 }
 0x26c   : > { %v829_v23 = vadd.f32 %v827_v21, %v456_v41 }
 0x26d   : > { %v830_v24 = vmax.f32 %v828_v22, 0.0 }
 0x26e   : > { %v831_v25 = vmax.f32 %v829_v23, 0.0 }
 0x26f   : > { %832 = vst [vmem:[%s325_s14] sm:$0xff] %v830_v24 }
 0x270   : > { %833 = vst [vmem:[%s325_s14 + $0x8] sm:$0xff] %v831_v25 }
 0x271   : > { %1318 = shalt.err (!%p1315_p2)
}
 0x272   : > { %s1319_s10 = scalar_lea.hbm %s1691_s9, 256  ;;  %s1323_s12 = scalar_lea.hbm %s1744_s7, 512 }
 0x273   : > { %p1320_p13 = scmp.ne.s32.totalorder %s1691_s9, %s1319_s10  ;;  %p1324_p4 = scmp.lt.u32.totalorder %s1691_s9, %s1744_s7 }
 0x274   : > { %p1325_p5 = scmp.lt.u32.totalorder %s1323_s12, %s1319_s10  ;;  %p1327_p11 = scmp.lt.u32.totalorder %s1319_s10, %s1691_s9 }
 0x275   : > { %p1321_p6 = pnand %p1320_p13, %p1758_p0 }
 0x276   : > { %p1326_p8 = por %p1325_p5, %p1324_p4 }
 0x277   : > { %p1322_p10 = pneg %p1321_p6 }
 0x278   : > { %p1328_p1 = por %p1327_p11, %p1326_p8 }
 0x27a   : > { %p1329_p3 = pnand %p1328_p1, %p1322_p10 }
 0x27c   : > { %1332 = shalt.err (!%p1329_p3)
}
 0x27d   : > { %s1387_s30 = smov 128   ;;  %s1388_s29 = smov 8  }
 0x27e   : > { %1122 = dma.vmem_to_hbm [thread:$0]  (%p1758_p0), %s1693_s18, 256, %s1691_s9, %s835_s28, %s1387_s30, %s1387_s30, %s1388_s29  }
 0x27f PF: > { %s863_s20 = sand.u32 1, %s1363_s24   ;;  %p1759_p7 = scmp.ne.s32.totalorder %s1749_s8, 0 }
 0x280   : > { %p1760_p9 = scmp.ge.s32.totalorder %s1375_s27, 2  ;;  %s864_s11 = scalar_lea.sflag [#allocation4], %s863_s20 }
 0x282   : > { %p1136_p12 = pnand %p1760_p9, %p1759_p7 }
 0x284   : > { %1358 = dma.done.wait (!%p1136_p12), %s864_s11, 256  }
 0x285   : > { %1360 = vsyncadd (!%p1136_p12), %s864_s11, 4294967040  ;;  %p21_p2 = scmp.ge.s32.totalorder %s1539_s13, 4   ;;  %s1761_s24 = smov %s1367_s25 }
 0x286   : > { %s1762_s25 = smov %s1371_s26  ;;  %s1763_s26 = smov %s1555_s17 }
 0x287   : > { %s1764_s27 = smov %s1539_s13  ;;  %23 = sbr.rel (!%p21_p2) target bundleno = 6 (0x6), region = 103 }
 0x28e   :  { %869 = vsyncpa [#allocation3], 1 }
 0x28f   :  { %871 = vsyncpa [#allocation3 + $0x1], 1 }
 0x290   :  { %872 = vsyncpa [#allocation6], 1 }
 0x291   :  { %873 = vsyncpa [#allocation4], 1 }
 0x292   :  { %875 = vsyncpa [#allocation4 + $0x1], 1 }

</bundles_post_ra>
